<compile_context>
chip_gen: v7x
topology: tpu7x:2x2x1
jax: 0.10.0
libtpu: 0.0.40
codegen_flags: <defaults>
</compile_context>

<pallas_src>
import jax
import jax.numpy as jnp
from jax import lax
from jax.experimental import pallas as pl
from jax.experimental.pallas import tpu as pltpu


def _round_up(v: int, m: int) -> int:
    return -(-v // m) * m


def make_tv_loss(strength: float,
                 *,
                 num_parallel_chunks: int = 1,
                 core_parallel: bool = False,
                 target_tile_bytes: int = 6 * 1024 * 1024):
    """Returns tv_loss(x) -> scalar matching TVLoss(strength).forward for NCHW x.

    num_parallel_chunks=1 is best on single-TC v5e/v6e; on v7x use
    num_parallel_chunks=2, core_parallel=True so the two TensorCores each get
    one chunk of the image axis.
    """
    acc_dtype = jnp.float32

    def tv_loss_impl(x):
        N, C, H, W = x.shape
        B, HW = N * C, H * W

        # ---- wrapper-side repack: lane-dense 2-D slab (images x flattened H*W).
        x2 = x.reshape(B, HW)
        itemsize = x2.dtype.itemsize
        bytes_per_row = HW * itemsize

        # ---- tile sizing: ~target_tile_bytes per input tile; VMEM usage is
        #      2 pipeline buffers + two (8, HW) f32 mask scratches.
        mask_bytes = 2 * 8 * HW * 4
        n_par = max(1, int(num_parallel_chunks))
        rows_per_chunk = _round_up(pl.cdiv(B, n_par), 8)
        rows_per_tile = max(8, (target_tile_bytes // max(bytes_per_row, 1)) // 8 * 8)
        rows_per_tile = min(rows_per_tile, 1024, rows_per_chunk)
        steps = pl.cdiv(rows_per_chunk, rows_per_tile)
        b_padded = n_par * steps * rows_per_tile

        if b_padded != B:
            # All-zero padding rows contribute exactly 0 to both diff terms.
            x2 = jnp.concatenate(
                [x2, jnp.zeros((b_padded - B, HW), x2.dtype)], axis=0)

        n_slabs = rows_per_tile // 8
        unroll = min(4, n_slabs)

        # Explicit VMEM budget: generous but <= physical on all generations.
        # TODO(synk): for very large H*W (>~1.5M f32 elements per image) the
        # lane axis itself should be column-tiled with a W-halo for the roll;
        # not implemented here.
        vmem_need = 2 * rows_per_tile * bytes_per_row + mask_bytes + (2 << 20)
        vmem_limit = int(min(max(32 << 20, vmem_need), 48 << 20))

        def tv_kernel(x_ref, o_ref, mw_ref, mh_ref):
            s = pl.program_id(1)

            @pl.when(s == 0)
            def _init():
                # 0/1 multiply-masks, built once per chunk so the non-pow2
                # integer modulo is paid once instead of per element per step.
                lane = lax.broadcasted_iota(jnp.int32, (8, HW), 1)
                mw_ref[...] = jnp.where(lane % W != 0, 1.0, 0.0).astype(acc_dtype)
                mh_ref[...] = jnp.where(lane >= W, 1.0, 0.0).astype(acc_dtype)
                o_ref[...] = jnp.zeros_like(o_ref)

            def slab(g, carry):
                r = pl.multiple_of(g * 8, 8)
                xv = x_ref[pl.ds(r, 8), :].astype(acc_dtype)       # (8, HW)
                # "current minus previous" finite differences via XLU rolls.
                d_w = jnp.abs(xv - pltpu.roll(xv, shift=1, axis=1))
                d_h = jnp.abs(xv - pltpu.roll(xv, shift=W, axis=1))
                t = d_w * mw_ref[...] + d_h * mh_ref[...]
                # Per-slab cross-lane reduce (XLU slot: free under VPU/HBM bound).
                return carry + jnp.sum(t, axis=1, keepdims=True)

            tile_sum = lax.fori_loop(0, n_slabs, slab,
                                     jnp.zeros((8, 1), acc_dtype),
                                     unroll=unroll)
            # Output block is resident across the "arbitrary" axis: use it as
            # the accumulator directly (written back to HBM once per chunk).
            o_ref[...] += tile_sum

        first_sem = pltpu.CORE_PARALLEL if core_parallel else pltpu.PARALLEL

        grid_spec = pltpu.PrefetchScalarGridSpec(
            num_scalar_prefetch=0,
            grid=(n_par, steps),
            in_specs=[
                pl.BlockSpec((rows_per_tile, HW),
                             lambda p, s: (p * steps + s, 0)),
            ],
            out_specs=pl.BlockSpec((8, 1), lambda p, s: (p, 0)),
            scratch_shapes=[pltpu.VMEM((8, HW), acc_dtype),
                            pltpu.VMEM((8, HW), acc_dtype)],
        )

        partials = pl.pallas_call(
            tv_kernel,
            out_shape=jax.ShapeDtypeStruct((n_par * 8, 1), acc_dtype),
            grid_spec=grid_spec,
            compiler_params=pltpu.CompilerParams(
                dimension_semantics=(first_sem, pltpu.ARBITRARY),
                vmem_limit_bytes=vmem_limit),
            cost_estimate=pl.CostEstimate(
                flops=7 * b_padded * HW,
                transcendentals=0,
                bytes_accessed=b_padded * HW * itemsize + n_par * 8 * 4),
        )(x2)

        # Cross-chunk combine + strength scaling (tiny, plain XLA).
        return jnp.float32(strength) * jnp.sum(partials)

    return jax.jit(tv_loss_impl)


if __name__ == "__main__":
    strength = 1e-3  # TVLoss(strength)

    key = jax.random.PRNGKey(0)
    x = jax.random.normal(key, (2, 4, 16, 16), dtype=jnp.float32)  # NCHW

    tv_loss = make_tv_loss(strength)
    loss = jax.block_until_ready(tv_loss(x))

    # Pure-JAX reference (same math as the PyTorch forward).
    x_diff = x[:, :, 1:, :] - x[:, :, :-1, :]
    y_diff = x[:, :, :, 1:] - x[:, :, :, :-1]
    ref = strength * (jnp.sum(jnp.abs(x_diff)) + jnp.sum(jnp.abs(y_diff)))
    assert jnp.allclose(loss, ref, rtol=1e-5, atol=1e-6), (loss, ref)

    print("KERNEL_OK")
</pallas_src>

<mosaic_0001>
module attributes {stable_mosaic.version = 11 : i64} {
  func.func @tv_kernel(%arg0: i32, %arg1: i32, %arg2: memref<8x256xf32, #tpu.memory_space<vmem>>, %arg3: memref<8x1xf32, #tpu.memory_space<vmem>>, %arg4: memref<8x256xf32, #tpu.memory_space<vmem>>, %arg5: memref<8x256xf32, #tpu.memory_space<vmem>>) attributes {dimension_semantics = [#tpu.dimension_semantics<parallel>, #tpu.dimension_semantics<arbitrary>], iteration_bounds = array<i64: 1, 1>, scalar_prefetch = 0 : i64, scratch_operands = 2 : i64, tpu.core_type = #tpu.core_type<tc>, window_params = [{transform_indices = @transform_0, window_bounds = array<i64: 8, 256>}, {transform_indices = @transform_1, window_bounds = array<i64: 8, 1>}]} {
    %c0_i32 = arith.constant 0 : i32
    %0 = arith.cmpi eq, %arg1, %c0_i32 : i32
    %1 = arith.extui %0 : i1 to i32
    %c0_i32_0 = arith.constant 0 : i32
    %2 = arith.cmpi ne, %1, %c0_i32_0 : i32
    scf.if %2 {
      %25 = tpu.iota {dimensions = array<i32: 1>} : vector<8x256xi32>
      %c16_i32_12 = arith.constant 16 : i32
      %c0_i32_13 = arith.constant 0 : i32
      %26 = arith.cmpi eq, %c16_i32_12, %c0_i32_13 : i32
      %c1_i32_14 = arith.constant 1 : i32
      %27 = arith.select %26, %c1_i32_14, %c16_i32_12 : i32
      %28 = vector.broadcast %27 : i32 to vector<8x256xi32>
      %29 = arith.remsi %25, %28 : vector<8x256xi32>
      %c0_i32_15 = arith.constant 0 : i32
      %30 = vector.broadcast %c0_i32_15 : i32 to vector<8x256xi32>
      %31 = arith.cmpi ne, %29, %30 : vector<8x256xi32>
      %c0_i32_16 = arith.constant 0 : i32
      %32 = vector.broadcast %c0_i32_16 : i32 to vector<8x256xi32>
      %33 = arith.cmpi slt, %29, %32 : vector<8x256xi32>
      %c0_i32_17 = arith.constant 0 : i32
      %34 = arith.cmpi slt, %27, %c0_i32_17 : i32
      %35 = vector.broadcast %34 : i1 to vector<8x256xi1>
      %36 = vector.broadcast %35 : vector<8x256xi1> to vector<8x256xi1>
      %37 = arith.xori %33, %36 : vector<8x256xi1>
      %38 = arith.andi %37, %31 : vector<8x256xi1>
      %39 = vector.broadcast %27 : i32 to vector<8x256xi32>
      %40 = arith.addi %29, %39 : vector<8x256xi32>
      %41 = arith.select %38, %40, %29 : vector<8x256xi1>, vector<8x256xi32>
      %c0_i32_18 = arith.constant 0 : i32
      %42 = vector.broadcast %c0_i32_18 : i32 to vector<8x256xi32>
      %43 = arith.cmpi ne, %41, %42 : vector<8x256xi32>
      %cst_19 = arith.constant 1.000000e+00 : f32
      %cst_20 = arith.constant 0.000000e+00 : f32
      %44 = vector.broadcast %cst_19 : f32 to vector<8x256xf32>
      %45 = vector.broadcast %cst_20 : f32 to vector<8x256xf32>
      %46 = arith.select %43, %44, %45 : vector<8x256xi1>, vector<8x256xf32>
      %c0_21 = arith.constant 0 : index
      %c0_22 = arith.constant 0 : index
      %47 = vector.load %arg4[%c0_21, %c0_22] : memref<8x256xf32, #tpu.memory_space<vmem>>, vector<8x256xf32>
      tpu.vector_store %arg4[%c0_21, %c0_22], %46 {strides = array<i32>} : memref<8x256xf32, #tpu.memory_space<vmem>>, vector<8x256xf32>,
      %c16_i32_23 = arith.constant 16 : i32
      %48 = vector.broadcast %c16_i32_23 : i32 to vector<8x256xi32>
      %49 = arith.cmpi sge, %25, %48 : vector<8x256xi32>
      %cst_24 = arith.constant 1.000000e+00 : f32
      %cst_25 = arith.constant 0.000000e+00 : f32
      %50 = vector.broadcast %cst_24 : f32 to vector<8x256xf32>
      %51 = vector.broadcast %cst_25 : f32 to vector<8x256xf32>
      %52 = arith.select %49, %50, %51 : vector<8x256xi1>, vector<8x256xf32>
      %c0_26 = arith.constant 0 : index
      %c0_27 = arith.constant 0 : index
      %53 = vector.load %arg5[%c0_26, %c0_27] : memref<8x256xf32, #tpu.memory_space<vmem>>, vector<8x256xf32>
      tpu.vector_store %arg5[%c0_26, %c0_27], %52 {strides = array<i32>} : memref<8x256xf32, #tpu.memory_space<vmem>>, vector<8x256xf32>,
      %cst_28 = arith.constant 0.000000e+00 : f32
      %54 = vector.broadcast %cst_28 : f32 to vector<8x1xf32>
      %c0_29 = arith.constant 0 : index
      %c0_30 = arith.constant 0 : index
      %55 = vector.load %arg3[%c0_29, %c0_30] : memref<8x1xf32, #tpu.memory_space<vmem>>, vector<8x1xf32>
      tpu.vector_store %arg3[%c0_29, %c0_30], %54 {strides = array<i32>} : memref<8x1xf32, #tpu.memory_space<vmem>>, vector<8x1xf32>,
    } else {
    }
    %cst = arith.constant 0.000000e+00 : f32
    %3 = vector.broadcast %cst : f32 to vector<8x1xf32>
    %c0_i32_1 = arith.constant 0 : i32
    %c8_i32 = arith.constant 8 : i32
    %4 = arith.muli %c0_i32_1, %c8_i32 : i32
    %5 = tpu.assume_multiple %4, 8 : i32
    %6 = arith.index_cast %5 : i32 to index
    %c0 = arith.constant 0 : index
    %7 = vector.load %arg2[%6, %c0] : memref<8x256xf32, #tpu.memory_space<vmem>>, vector<8x256xf32>
    %c1_i32 = arith.constant 1 : i32
    %8 = tpu.dynamic_rotate %7 by %c1_i32 dim 1 : vector<8x256xf32>, i32 -> vector<8x256xf32>
    %9 = arith.subf %7, %8 : vector<8x256xf32>
    %10 = math.absf %9 : vector<8x256xf32>
    %c16_i32 = arith.constant 16 : i32
    %11 = tpu.dynamic_rotate %7 by %c16_i32 dim 1 : vector<8x256xf32>, i32 -> vector<8x256xf32>
    %12 = arith.subf %7, %11 : vector<8x256xf32>
    %13 = math.absf %12 : vector<8x256xf32>
    %c0_2 = arith.constant 0 : index
    %c0_3 = arith.constant 0 : index
    %14 = vector.load %arg4[%c0_2, %c0_3] : memref<8x256xf32, #tpu.memory_space<vmem>>, vector<8x256xf32>
    %15 = arith.mulf %10, %14 : vector<8x256xf32>
    %c0_4 = arith.constant 0 : index
    %c0_5 = arith.constant 0 : index
    %16 = vector.load %arg5[%c0_4, %c0_5] : memref<8x256xf32, #tpu.memory_space<vmem>>, vector<8x256xf32>
    %17 = arith.mulf %13, %16 : vector<8x256xf32>
    %18 = arith.addf %15, %17 : vector<8x256xf32>
    %cst_6 = arith.constant dense<0.000000e+00> : vector<8xf32>
    %19 = vector.multi_reduction <add>, %18, %cst_6 [1] : vector<8x256xf32> to vector<8xf32>
    %20 = vector.shape_cast %19 : vector<8xf32> to vector<8x1xf32>
    %21 = arith.addf %3, %20 : vector<8x1xf32>
    %c1_i32_7 = arith.constant 1 : i32
    %c0_8 = arith.constant 0 : index
    %c0_9 = arith.constant 0 : index
    %22 = vector.load %arg3[%c0_8, %c0_9] : memref<8x1xf32, #tpu.memory_space<vmem>>, vector<8x1xf32>
    %23 = arith.addf %22, %21 : vector<8x1xf32>
    %c0_10 = arith.constant 0 : index
    %c0_11 = arith.constant 0 : index
    %24 = vector.load %arg3[%c0_10, %c0_11] : memref<8x1xf32, #tpu.memory_space<vmem>>, vector<8x1xf32>
    tpu.vector_store %arg3[%c0_10, %c0_11], %23 {strides = array<i32>} : memref<8x1xf32, #tpu.memory_space<vmem>>, vector<8x1xf32>,
    return
  }
  func.func @transform_0(%arg0: i32, %arg1: i32) -> (i32, i32) {
    %c1_i32 = arith.constant 1 : i32
    %0 = arith.muli %arg0, %c1_i32 : i32
    %1 = arith.addi %0, %arg1 : i32
    %c0_i32 = arith.constant 0 : i32
    %c0_i32_0 = arith.constant 0 : i32
    return %1, %c0_i32 : i32, i32
  }
  func.func @transform_1(%arg0: i32, %arg1: i32) -> (i32, i32) {
    %c0_i32 = arith.constant 0 : i32
    %c0_i32_0 = arith.constant 0 : i32
    return %arg0, %c0_i32 : i32, i32
  }
}

</mosaic_0001>

<bundles_post_ra>
// kernel: tv_loss_impl.1
= control target key start
LH: loop header
LB: loop body
LE: loop exit
PB: predicated region body
PF: predicated region fallthrough
CT: control target
= control target key end

     0   :  { %s133_s8 = smov 16   ;;  %s134_s9 = smov 1   ;;  %vm71_vm0 = vcmask 7168   ;;  %v135_v2 = vmov 0.0   ;;  %v32_v3 = vlaneseq  ;;  %s163_s0 = inlined_call_operand.vmem [shape: f32[8,256], index: 0, kind: input, shape index: {}]   ;;  %s164_s1 = inlined_call_operand.vmem [shape: f32[8,1], index: 1, kind: output, shape index: {}]  }
   0x1   :  { %v76_v0 = vld [vmem:[%s163_s0] sm:$0xff]  ;;  %v77_v1 = vld [vmem:[%s163_s0 + $0x8] sm:$0xff]  ;;  %72 = vst.msk [vmem:[%s164_s1] sm:$0xff] %vm71_vm0, %v135_v2 }
   0x2   :  { %91 = vrot.lane.b32.xlu1 %v76_v0, %s133_s8  ;;  %78 = vrot.lane.b32.xlu0 %v76_v0, %s134_s9  ;;  %v33_v4 = vand.u32 127, %v32_v3 }
   0x4   :  { %v34_v5 = vadd.s32 128, %v33_v4  ;;  %v39_v8 = vand.u32 15, %v33_v4  ;;  %vm95_vm1 = vcmp.lt.s32.totalorder %v33_v4, 16  ;;  %vm84_vm2 = vcmp.lt.s32.totalorder %v33_v4, 1 }
   0x5   :  { %vm65_vm3 = vcmp.ge.s32.totalorder %v33_v4, 16 }
   0x6   :  { %93 = vrot.lane.b32.xlu1 %v77_v1, %s133_s8  ;;  %80 = vrot.lane.b32.xlu0 %v77_v1, %s134_s9  ;;  %v46_v9 = vand.u32 15, %v34_v5  ;;  %vm59_vm4 = vcmp.ne.s32.totalorder %v39_v8, 0  ;;  %v67_v19 = vsel %vm65_vm3, 1.0, %v135_v2 }
   0x7   :  { %v61_v21 = vsel %vm59_vm4, 1.0, %v135_v2 }
   0x8   :  { %vm60_vm5 = vcmp.ne.s32.totalorder %v46_v9, 0  ;;  %v116_v33 = vld [vmem:[%s164_s1] sm:$0xff] }
   0x9   :  { %v62_v23 = vsel %vm60_vm5, 1.0, %v135_v2 }
  0x74   :  { %v92_v6 = vpop.permute.xlu1 %91  ;;  %v79_v7 = vpop.permute.xlu0 %78 }
  0x78   :  { %v94_v10 = vpop.permute.xlu1 %93  ;;  %v81_v11 = vpop.permute.xlu0 %80 }
  0x79   :  { %v96_v12 = vsel %vm95_vm1, %v92_v6, %v94_v10  ;;  %v97_v13 = vsel %vm95_vm1, %v94_v10, %v92_v6  ;;  %v85_v14 = vsel %vm84_vm2, %v79_v7, %v81_v11  ;;  %v86_v15 = vsel %vm84_vm2, %v81_v11, %v79_v7 }
  0x7a   :  { %v98_v16 = vsub.f32 %v76_v0, %v97_v13  ;;  %v87_v17 = vsub.f32 %v76_v0, %v86_v15  ;;  %v88_v18 = vsub.f32 %v77_v1, %v85_v14  ;;  %v99_v20 = vsub.f32 %v77_v1, %v96_v12 }
  0x7c   :  { %v100_v22 = vand.u32 2147483647, %v98_v16  ;;  %v89_v24 = vand.u32 2147483647, %v87_v17  ;;  %v90_v25 = vand.u32 2147483647, %v88_v18 }
  0x7d   :  { %v101_v28 = vand.u32 2147483647, %v99_v20 }
  0x7e   :  { %v108_v26 = vmul.f32 %v100_v22, %v67_v19  ;;  %v104_v27 = vmul.f32 %v89_v24, %v61_v21  ;;  %v105_v29 = vmul.f32 %v90_v25, %v62_v23 }
  0x80   :  { %v110_v30 = vadd.f32 %v108_v26, %v104_v27  ;;  %v111_v31 = vadd.f32 %v105_v29, %v101_v28 }
  0x82   :  { %v112_v32 = vadd.f32 %v111_v31, %v110_v30 }
  0x84   :  { %113 = vadd.xlane.f32.xlu0 %v112_v32 }
 0x111   :  { %v114_v34 = vpop.xlane.xlu0 %113 }
 0x112   :  { %v117_v35 = vadd.f32 %v116_v33, %v114_v34 }
 0x114   :  { %119 = vst.msk [vmem:[%s164_s1] sm:$0xff] %vm71_vm0, %v117_v35 }

</bundles_post_ra>
